<compile_context>
chip_gen: v6e
topology: v6e:2x2x1
jax: 0.10.0
libtpu: 0.0.40
codegen_flags: <defaults>
</compile_context>

<pallas_src>
import jax
import jax.numpy as jnp
from jax.experimental import pallas as pl
from jax.experimental.pallas import tpu as pltpu


def _round_up(n, m):
    return ((n + m - 1) // m) * m


def critic_kernel(x_ref, w1_ref, b1_ref, w2_ref, b2_ref, w3_ref, b3_ref, q_ref):
    mm_dtype = w1_ref.dtype
    x = x_ref[...]                                           # [TBp, PACK*D_in]
    # fc1 + relu (MXU matmul, f32 accumulate; bias/ReLU in f32)
    h1 = jnp.dot(x, w1_ref[...], preferred_element_type=jnp.float32) + b1_ref[...]
    h1 = jnp.maximum(h1, 0.0)
    # fc2 + relu
    h2 = jnp.dot(h1.astype(mm_dtype), w2_ref[...],
                 preferred_element_type=jnp.float32) + b2_ref[...]
    h2 = jnp.maximum(h2, 0.0)
    # fc3: block-diagonal [PACK*H, PACK] weight -> packed q, lane-dense [TBp, PACK]
    q = jnp.dot(h2.astype(mm_dtype), w3_ref[...],
                preferred_element_type=jnp.float32) + b3_ref[...]
    q_ref[...] = q.astype(q_ref.dtype)


def _block_diag(w, pack):
    """[in, out] -> [pack*in, pack*out] with `pack` copies of w on the diagonal."""
    if pack == 1:
        return w
    return jnp.kron(jnp.eye(pack, dtype=w.dtype), w)


def critic_forward(x, params, *, block_batch=8192, use_bf16_matmul=False):
    """x: [B, input_shape] f32; params: dict of w1,b1,w2,b2,w3,b3 ([in,out] weights)."""
    w1, b1 = params["w1"], params["b1"]
    w2, b2 = params["w2"], params["b2"]
    w3, b3 = params["w3"], params["b3"]

    B, d_in = x.shape
    h = w1.shape[1]

    # ---- lane packing: PACK consecutive batch rows per 128-lane row ---------
    pack = max(1, 128 // max(d_in, h))
    bp = pl.cdiv(B, pack)                          # packed batch rows
    if bp * pack != B:                             # tiny (< PACK-row) pad only
        x = jnp.pad(x, ((0, bp * pack - B), (0, 0)))
    x_packed = x.reshape(bp, pack * d_in)          # free row-major reshape

    w1p = _block_diag(w1, pack)                    # [PACK*D_in, PACK*H]
    w2p = _block_diag(w2, pack)                    # [PACK*H,   PACK*H]
    w3p = _block_diag(w3, pack)                    # [PACK*H,   PACK]
    b1p = jnp.tile(b1, (1, pack))                  # [1, PACK*H]
    b2p = jnp.tile(b2, (1, pack))                  # [1, PACK*H]
    b3p = jnp.tile(b3, (1, pack))                  # [1, PACK]

    mm_dtype = jnp.bfloat16 if use_bf16_matmul else jnp.float32
    x_packed = x_packed.astype(mm_dtype)
    w1p = w1p.astype(mm_dtype)
    w2p = w2p.astype(mm_dtype)
    w3p = w3p.astype(mm_dtype)

    # ---- batch tile selection ------------------------------------------------
    sub = 16 if mm_dtype == jnp.bfloat16 else 8    # sublane granularity
    tile_target = max(sub, block_batch // pack)    # packed rows per grid step
    if bp <= tile_target:
        if bp >= 1024:
            # enough work: give v7x's two TensorCores (and pipelining) >= 8 steps
            tbp = _round_up(pl.cdiv(bp, 8), sub)
        else:
            tbp = bp                               # single full-extent block
    else:
        tbp = _round_up(tile_target, sub)
    grid = (pl.cdiv(bp, tbp),)                     # final partial block is masked

    resident = lambda i: (0, 0)                    # weights stay VMEM-resident
    out = pl.pallas_call(
        critic_kernel,
        out_shape=jax.ShapeDtypeStruct((bp, pack), jnp.float32),
        grid_spec=pltpu.PrefetchScalarGridSpec(
            num_scalar_prefetch=0,
            grid=grid,
            in_specs=[
                pl.BlockSpec((tbp, pack * d_in), lambda i: (i, 0)),  # x streams
                pl.BlockSpec((pack * d_in, pack * h), resident),     # w1
                pl.BlockSpec((1, pack * h), resident),               # b1
                pl.BlockSpec((pack * h, pack * h), resident),        # w2
                pl.BlockSpec((1, pack * h), resident),               # b2
                pl.BlockSpec((pack * h, pack), resident),            # w3
                pl.BlockSpec((1, pack), resident),                   # b3
            ],
            out_specs=pl.BlockSpec((tbp, pack), lambda i: (i, 0)),
        ),
        compiler_params=pltpu.CompilerParams(
            dimension_semantics=("parallel",),     # shards grid across TCs on v7x
        ),
    )(x_packed, w1p, b1p, w2p, b2p, w3p, b3p)

    # un-pack: [bp, PACK] -> [bp*PACK, 1] (free reshape), trim the pad rows
    return out.reshape(bp * pack, 1)[:B]


def init_params(key, input_shape, critic_dim):
    """Deterministic synthetic init (PyTorch nn.Linear-like uniform bounds)."""
    ks = jax.random.split(key, 6)

    def lin(kw, kb, fan_in, fan_out):
        bound = 1.0 / jnp.sqrt(fan_in)
        # weight stored as [in, out] (transpose of PyTorch [out, in])
        w = jax.random.uniform(kw, (fan_in, fan_out), jnp.float32, -bound, bound)
        b = jax.random.uniform(kb, (1, fan_out), jnp.float32, -bound, bound)
        return w, b

    w1, b1 = lin(ks[0], ks[1], input_shape, critic_dim)
    w2, b2 = lin(ks[2], ks[3], critic_dim, critic_dim)
    w3, b3 = lin(ks[4], ks[5], critic_dim, 1)
    return {"w1": w1, "b1": b1, "w2": w2, "b2": b2, "w3": w3, "b3": b3}


def critic_ref(x, p):
    h1 = jnp.maximum(x @ p["w1"] + p["b1"], 0.0)
    h2 = jnp.maximum(h1 @ p["w2"] + p["b2"], 0.0)
    return h2 @ p["w3"] + p["b3"]


if __name__ == "__main__":
    input_shape = 32   # flattened critic input
    critic_dim = 32    # args.critic_dim

    key = jax.random.PRNGKey(0)
    k_x, k_p, k_x2 = jax.random.split(key, 3)
    params = init_params(k_p, input_shape, critic_dim)

    # Case 1: small batch (multiple of PACK), single grid step.
    x = jax.random.normal(k_x, (8, input_shape), jnp.float32)
    q = jax.block_until_ready(critic_forward(x, params))
    q_ref = critic_ref(x, params)
    assert q.shape == (8, 1)
    assert jnp.allclose(q, q_ref, atol=1e-5, rtol=1e-5), "mismatch vs JAX reference (B=8)"

    # Case 2: batch not a multiple of PACK, multi-step grid with a masked
    # partial final block (exercises packing pad + ragged grid).
    x2 = jax.random.normal(k_x2, (50, input_shape), jnp.float32)
    q2 = jax.block_until_ready(critic_forward(x2, params, block_batch=16))
    q2_ref = critic_ref(x2, params)
    assert q2.shape == (50, 1)
    assert jnp.allclose(q2, q2_ref, atol=1e-5, rtol=1e-5), "mismatch vs JAX reference (B=50)"

    # Case 3: optional bf16 MXU operands (v6e/v7x path), loose tolerance.
    q3 = jax.block_until_ready(critic_forward(x2, params, use_bf16_matmul=True))
    assert q3.shape == (50, 1)
    assert jnp.allclose(q3, q2_ref, atol=1e-1, rtol=1e-1), "bf16 matmul path mismatch"

    print("KERNEL_OK")
</pallas_src>

<mosaic_0001>
module attributes {stable_mosaic.version = 11 : i64} {
  func.func @critic_kernel(%arg0: i32, %arg1: memref<2x128xf32, #tpu.memory_space<vmem>>, %arg2: memref<128x128xf32, #tpu.memory_space<vmem>>, %arg3: memref<1x128xf32, #tpu.memory_space<vmem>>, %arg4: memref<128x128xf32, #tpu.memory_space<vmem>>, %arg5: memref<1x128xf32, #tpu.memory_space<vmem>>, %arg6: memref<128x4xf32, #tpu.memory_space<vmem>>, %arg7: memref<1x4xf32, #tpu.memory_space<vmem>>, %arg8: memref<2x4xf32, #tpu.memory_space<vmem>>) attributes {dimension_semantics = [#tpu.dimension_semantics<parallel>], iteration_bounds = array<i64: 1>, scalar_prefetch = 0 : i64, scratch_operands = 0 : i64, tpu.core_type = #tpu.core_type<tc>, window_params = [{transform_indices = @transform_0, window_bounds = array<i64: 2, 128>}, {pipeline_mode = #tpu.pipeline_mode<synchronous>, transform_indices = @transform_1, window_bounds = array<i64: 128, 128>}, {pipeline_mode = #tpu.pipeline_mode<synchronous>, transform_indices = @transform_2, window_bounds = array<i64: 1, 128>}, {pipeline_mode = #tpu.pipeline_mode<synchronous>, transform_indices = @transform_3, window_bounds = array<i64: 128, 128>}, {pipeline_mode = #tpu.pipeline_mode<synchronous>, transform_indices = @transform_4, window_bounds = array<i64: 1, 128>}, {pipeline_mode = #tpu.pipeline_mode<synchronous>, transform_indices = @transform_5, window_bounds = array<i64: 128, 4>}, {pipeline_mode = #tpu.pipeline_mode<synchronous>, transform_indices = @transform_6, window_bounds = array<i64: 1, 4>}, {transform_indices = @transform_7, window_bounds = array<i64: 2, 4>}]} {
    %c0 = arith.constant 0 : index
    %c0_0 = arith.constant 0 : index
    %0 = vector.load %arg1[%c0, %c0_0] : memref<2x128xf32, #tpu.memory_space<vmem>>, vector<2x128xf32>
    %c0_1 = arith.constant 0 : index
    %c0_2 = arith.constant 0 : index
    %1 = vector.load %arg2[%c0_1, %c0_2] : memref<128x128xf32, #tpu.memory_space<vmem>>, vector<128x128xf32>
    %cst = arith.constant dense<0.000000e+00> : vector<2x128xf32>
    %2 = tpu.matmul %0, %1, %cst {dimension_numbers = #tpu.dot_dimension_numbers<[1], [0], [0], [1], [0, 0, 1, 1], [], []>} : vector<2x128xf32>, vector<128x128xf32>, vector<2x128xf32> -> vector<2x128xf32>
    %c0_3 = arith.constant 0 : index
    %c0_4 = arith.constant 0 : index
    %3 = vector.load %arg3[%c0_3, %c0_4] : memref<1x128xf32, #tpu.memory_space<vmem>>, vector<1x128xf32>
    %4 = vector.broadcast %3 : vector<1x128xf32> to vector<2x128xf32>
    %5 = arith.addf %2, %4 : vector<2x128xf32>
    %cst_5 = arith.constant 0.000000e+00 : f32
    %6 = vector.broadcast %cst_5 : f32 to vector<2x128xf32>
    %7 = arith.maximumf %5, %6 : vector<2x128xf32>
    %c0_6 = arith.constant 0 : index
    %c0_7 = arith.constant 0 : index
    %8 = vector.load %arg4[%c0_6, %c0_7] : memref<128x128xf32, #tpu.memory_space<vmem>>, vector<128x128xf32>
    %cst_8 = arith.constant dense<0.000000e+00> : vector<2x128xf32>
    %9 = tpu.matmul %7, %8, %cst_8 {dimension_numbers = #tpu.dot_dimension_numbers<[1], [0], [0], [1], [0, 0, 1, 1], [], []>} : vector<2x128xf32>, vector<128x128xf32>, vector<2x128xf32> -> vector<2x128xf32>
    %c0_9 = arith.constant 0 : index
    %c0_10 = arith.constant 0 : index
    %10 = vector.load %arg5[%c0_9, %c0_10] : memref<1x128xf32, #tpu.memory_space<vmem>>, vector<1x128xf32>
    %11 = vector.broadcast %10 : vector<1x128xf32> to vector<2x128xf32>
    %12 = arith.addf %9, %11 : vector<2x128xf32>
    %cst_11 = arith.constant 0.000000e+00 : f32
    %13 = vector.broadcast %cst_11 : f32 to vector<2x128xf32>
    %14 = arith.maximumf %12, %13 : vector<2x128xf32>
    %c0_12 = arith.constant 0 : index
    %c0_13 = arith.constant 0 : index
    %15 = vector.load %arg6[%c0_12, %c0_13] : memref<128x4xf32, #tpu.memory_space<vmem>>, vector<128x4xf32>
    %cst_14 = arith.constant dense<0.000000e+00> : vector<2x4xf32>
    %16 = tpu.matmul %14, %15, %cst_14 {dimension_numbers = #tpu.dot_dimension_numbers<[1], [0], [0], [1], [0, 0, 1, 1], [], []>} : vector<2x128xf32>, vector<128x4xf32>, vector<2x4xf32> -> vector<2x4xf32>
    %c0_15 = arith.constant 0 : index
    %c0_16 = arith.constant 0 : index
    %17 = vector.load %arg7[%c0_15, %c0_16] : memref<1x4xf32, #tpu.memory_space<vmem>>, vector<1x4xf32>
    %18 = vector.broadcast %17 : vector<1x4xf32> to vector<2x4xf32>
    %19 = arith.addf %16, %18 : vector<2x4xf32>
    %c0_17 = arith.constant 0 : index
    %c0_18 = arith.constant 0 : index
    %20 = vector.load %arg8[%c0_17, %c0_18] : memref<2x4xf32, #tpu.memory_space<vmem>>, vector<2x4xf32>
    tpu.vector_store %arg8[%c0_17, %c0_18], %19 {strides = array<i32>} : memref<2x4xf32, #tpu.memory_space<vmem>>, vector<2x4xf32>,
    return
  }
  func.func @transform_0(%arg0: i32) -> (i32, i32) {
    %c0_i32 = arith.constant 0 : i32
    %c0_i32_0 = arith.constant 0 : i32
    return %arg0, %c0_i32 : i32, i32
  }
  func.func @transform_1(%arg0: i32) -> (i32, i32) {
    %c0_i32 = arith.constant 0 : i32
    %c0_i32_0 = arith.constant 0 : i32
    %c0_i32_1 = arith.constant 0 : i32
    return %c0_i32, %c0_i32_0 : i32, i32
  }
  func.func @transform_2(%arg0: i32) -> (i32, i32) {
    %c0_i32 = arith.constant 0 : i32
    %c0_i32_0 = arith.constant 0 : i32
    %c0_i32_1 = arith.constant 0 : i32
    return %c0_i32, %c0_i32_0 : i32, i32
  }
  func.func @transform_3(%arg0: i32) -> (i32, i32) {
    %c0_i32 = arith.constant 0 : i32
    %c0_i32_0 = arith.constant 0 : i32
    %c0_i32_1 = arith.constant 0 : i32
    return %c0_i32, %c0_i32_0 : i32, i32
  }
  func.func @transform_4(%arg0: i32) -> (i32, i32) {
    %c0_i32 = arith.constant 0 : i32
    %c0_i32_0 = arith.constant 0 : i32
    %c0_i32_1 = arith.constant 0 : i32
    return %c0_i32, %c0_i32_0 : i32, i32
  }
  func.func @transform_5(%arg0: i32) -> (i32, i32) {
    %c0_i32 = arith.constant 0 : i32
    %c0_i32_0 = arith.constant 0 : i32
    %c0_i32_1 = arith.constant 0 : i32
    return %c0_i32, %c0_i32_0 : i32, i32
  }
  func.func @transform_6(%arg0: i32) -> (i32, i32) {
    %c0_i32 = arith.constant 0 : i32
    %c0_i32_0 = arith.constant 0 : i32
    %c0_i32_1 = arith.constant 0 : i32
    return %c0_i32, %c0_i32_0 : i32, i32
  }
  func.func @transform_7(%arg0: i32) -> (i32, i32) {
    %c0_i32 = arith.constant 0 : i32
    %c0_i32_0 = arith.constant 0 : i32
    return %arg0, %c0_i32 : i32, i32
  }
}

</mosaic_0001>

<bundles_post_ra>
// kernel: tpu_custom_call.1
= control target key start
LH: loop header
LB: loop body
LE: loop exit
PB: predicated region body
PF: predicated region fallthrough
CT: control target
= control target key end

     0   :  { %12 = vsyncpa [#allocation3], 0  ;;  %s763_s0 = inlined_call_operand.vmem [shape: f32[2,128], index: 0, kind: input, shape index: {}]   ;;  %s764_s1 = inlined_call_operand.vmem [shape: f32[128,128], index: 1, kind: input, shape index: {}]   ;;  %s765_s2 = inlined_call_operand.vmem [shape: f32[1,128], index: 2, kind: input, shape index: {}]   ;;  %s766_s3 = inlined_call_operand.hbm [shape: f32[128,128], index: 3, kind: input, shape index: {}]   ;;  %s767_s4 = inlined_call_operand.vmem [shape: f32[1,128], index: 4, kind: input, shape index: {}]   ;;  %s768_s5 = inlined_call_operand.vmem [shape: f32[128,4], index: 5, kind: input, shape index: {}]   ;;  %s769_s6 = inlined_call_operand.vmem [shape: f32[1,4], index: 6, kind: input, shape index: {}]   ;;  %s770_s7 = inlined_call_operand.hbm [shape: f32[2,4], index: 7, kind: output, shape index: {}]  }
   0x1   :  { %13 = vsyncpa [#allocation4], 0  ;;  %s549_s24 = smov [#allocation2]  }
   0x2   :  { %s25_s25 = sshll.u32 %s549_s24, 4  ;;  %s26_s25 = int_to_ptr.vmem [resolvable:$true] %s25_s25 }
   0x3   :  { %s513_s26 = scalar_lea.vmem %s26_s25, 2048  ;;  %p518_p1 = scmp.lt.s32.totalorder %s26_s25, %s26_s25 }
   0x4   :  { %p514_p0 = scmp.ne.s32.totalorder %s26_s25, %s513_s26  ;;  %p519_p2 = scmp.lt.s32.totalorder %s513_s26, %s513_s26 }
   0x6   :  { %p520_p3 = por %p519_p2, %p518_p1 }
   0x8   :  { %p521_p4 = pnand %p520_p3, %p514_p0 }
   0xa   :  { %524 = shalt.err (!%p521_p4)
}
   0xb   :  { %s550_s27 = smov 128   ;;  %s551_s28 = smov 8  }
   0xc   :  { %31 = dma.hbm_to_vmem [thread:$0]  %s766_s3, 2048, %s26_s25, [#allocation3], %s550_s27, %s550_s27, %s551_s28  }
   0xd   :  { %545 = dma.done.wait [#allocation3], 2048  }
   0xe   :  { %546 = vsyncadd [#allocation3], 4294965248  ;;  %v552_v0 = vmov 0.0   ;;  %vm553_vm0 = vmmov 0   ;;  %v57_v1 = vld [vmem:[%s764_s1 + $0x78] sm:$0xff]  ;;  %v56_v2 = vld [vmem:[%s764_s1 + $0x70] sm:$0xff] }
   0xf   :  { %394 = vmatprep.subr.mxu0 %v552_v0  ;;  %426 = vmatprep.mubr.msk.f32.mxu0 %vm553_vm0, %v552_v0  ;;  %v55_v3 = vld [vmem:[%s764_s1 + $0x68] sm:$0xff]  ;;  %v54_v4 = vld [vmem:[%s764_s1 + $0x60] sm:$0xff]  ;;  %v151_v5 = vld [vmem:[#allocation2 + $0x78] sm:$0xff]  ;;  %s554_s26 = smov [#allocation5]   ;;  %vm323_vm1 = vcmask 25600  }
  0x10   :  { %429 = vmatprep.subr.mxu1 %v552_v0  ;;  %461 = vmatprep.mubr.msk.f32.mxu1 %vm553_vm0, %v552_v0  ;;  %v53_v6 = vld [vmem:[%s764_s1 + $0x58] sm:$0xff]  ;;  %v150_v7 = vld [vmem:[#allocation2 + $0x70] sm:$0xff]  ;;  %v149_v8 = vld [vmem:[#allocation2 + $0x68] sm:$0xff]  ;;  %s331_s27 = sshll.u32 %s554_s26, 4  ;;  %s332_s27 = int_to_ptr.vmem [resolvable:$true] %s331_s27 }
  0x11   :  { %395 = vmatpush3.msra.mxu0 %v57_v1  ;;  %430 = vmatpush3.msra.mxu1 %v151_v5  ;;  %v52_v9 = vld [vmem:[%s764_s1 + $0x50] sm:$0xff]  ;;  %v148_v10 = vld [vmem:[#allocation2 + $0x60] sm:$0xff]  ;;  %v51_v11 = vld [vmem:[%s764_s1 + $0x48] sm:$0xff]  ;;  %p530_p6 = scmp.lt.s32.totalorder %s332_s27, %s332_s27 }
  0x12   :  { %396 = vmatprep.subr.mxu0 %v552_v0  ;;  %431 = vmatprep.subr.mxu1 %v552_v0  ;;  %v147_v12 = vld [vmem:[#allocation2 + $0x58] sm:$0xff]  ;;  %v50_v13 = vld [vmem:[%s764_s1 + $0x40] sm:$0xff]  ;;  %v146_v14 = vld [vmem:[#allocation2 + $0x50] sm:$0xff] }
  0x13   :  { %397 = vmatpush3.msra.mxu0 %v56_v2  ;;  %432 = vmatpush3.msra.mxu1 %v150_v7  ;;  %v49_v15 = vld [vmem:[%s764_s1 + $0x38] sm:$0xff]  ;;  %v145_v16 = vld [vmem:[#allocation2 + $0x48] sm:$0xff]  ;;  %v48_v17 = vld [vmem:[%s764_s1 + $0x30] sm:$0xff] }
  0x14   :  { %398 = vmatprep.subr.mxu0 %v552_v0  ;;  %433 = vmatprep.subr.mxu1 %v552_v0  ;;  %v144_v18 = vld [vmem:[#allocation2 + $0x40] sm:$0xff]  ;;  %v47_v19 = vld [vmem:[%s764_s1 + $0x28] sm:$0xff]  ;;  %v143_v20 = vld [vmem:[#allocation2 + $0x38] sm:$0xff] }
  0x15   :  { %399 = vmatpush3.msra.mxu0 %v55_v3  ;;  %434 = vmatpush3.msra.mxu1 %v149_v8  ;;  %v46_v21 = vld [vmem:[%s764_s1 + $0x20] sm:$0xff]  ;;  %v142_v22 = vld [vmem:[#allocation2 + $0x30] sm:$0xff]  ;;  %v45_v23 = vld [vmem:[%s764_s1 + $0x18] sm:$0xff] }
  0x16   :  { %400 = vmatprep.subr.mxu0 %v552_v0  ;;  %435 = vmatprep.subr.mxu1 %v552_v0  ;;  %v141_v24 = vld [vmem:[#allocation2 + $0x28] sm:$0xff]  ;;  %v44_v25 = vld [vmem:[%s764_s1 + $0x10] sm:$0xff]  ;;  %v140_v26 = vld [vmem:[#allocation2 + $0x20] sm:$0xff] }
  0x17   :  { %401 = vmatpush3.msra.mxu0 %v54_v4  ;;  %436 = vmatpush3.msra.mxu1 %v148_v10  ;;  %v43_v27 = vld [vmem:[%s764_s1 + $0x8] sm:$0xff]  ;;  %v139_v28 = vld [vmem:[#allocation2 + $0x18] sm:$0xff]  ;;  %v42_v29 = vld [vmem:[%s764_s1] sm:$0xff] }
  0x18   :  { %402 = vmatprep.subr.mxu0 %v552_v0  ;;  %437 = vmatprep.subr.mxu1 %v552_v0  ;;  %v41_v30 = vld [vmem:[%s763_s0] sm:$0x3]  ;;  %v138_v31 = vld [vmem:[#allocation2 + $0x10] sm:$0xff]  ;;  %v137_v32 = vld [vmem:[#allocation2 + $0x8] sm:$0xff] }
  0x19   :  { %403 = vmatpush3.msra.mxu0 %v53_v6  ;;  %438 = vmatpush3.msra.mxu1 %v147_v12  ;;  %v136_v33 = vld [vmem:[#allocation2] sm:$0xff]  ;;  %v245_v34 = vld [vmem:[%s768_s5 + $0x78] sm:$0xff]  ;;  %v244_v35 = vld [vmem:[%s768_s5 + $0x70] sm:$0xff] }
  0x1a   :  { %404 = vmatprep.subr.mxu0 %v552_v0  ;;  %439 = vmatprep.subr.mxu1 %v552_v0  ;;  %v243_v36 = vld [vmem:[%s768_s5 + $0x68] sm:$0xff]  ;;  %v242_v37 = vld [vmem:[%s768_s5 + $0x60] sm:$0xff]  ;;  %v241_v38 = vld [vmem:[%s768_s5 + $0x58] sm:$0xff] }
  0x1b   :  { %405 = vmatpush3.msra.mxu0 %v52_v9  ;;  %440 = vmatpush3.msra.mxu1 %v146_v14  ;;  %v240_v39 = vld [vmem:[%s768_s5 + $0x50] sm:$0xff]  ;;  %v239_v40 = vld [vmem:[%s768_s5 + $0x48] sm:$0xff]  ;;  %v238_v41 = vld [vmem:[%s768_s5 + $0x40] sm:$0xff] }
  0x1c   :  { %406 = vmatprep.subr.mxu0 %v552_v0  ;;  %441 = vmatprep.subr.mxu1 %v552_v0  ;;  %v237_v42 = vld [vmem:[%s768_s5 + $0x38] sm:$0xff]  ;;  %v236_v43 = vld [vmem:[%s768_s5 + $0x30] sm:$0xff]  ;;  %v235_v44 = vld [vmem:[%s768_s5 + $0x28] sm:$0xff] }
  0x1d   :  { %407 = vmatpush3.msra.mxu0 %v51_v11  ;;  %442 = vmatpush3.msra.mxu1 %v145_v16  ;;  %v234_v45 = vld [vmem:[%s768_s5 + $0x20] sm:$0xff]  ;;  %v233_v46 = vld [vmem:[%s768_s5 + $0x18] sm:$0xff]  ;;  %v232_v52 = vld [vmem:[%s768_s5 + $0x10] sm:$0xff] }
  0x1e   :  { %408 = vmatprep.subr.mxu0 %v552_v0  ;;  %443 = vmatprep.subr.mxu1 %v552_v0  ;;  %v340_v47 = vld [vmem:[%s765_s2] ss:$0 sm:$0xff]  ;;  %v231_v53 = vld [vmem:[%s768_s5 + $0x8] sm:$0xff] }
  0x1f   :  { %409 = vmatpush3.msra.mxu0 %v50_v13  ;;  %444 = vmatpush3.msra.mxu1 %v144_v18  ;;  %v230_v54 = vld [vmem:[%s768_s5] sm:$0xff]  ;;  %s525_s5 = scalar_lea.vmem %s332_s27, 32 }
  0x20   :  { %410 = vmatprep.subr.mxu0 %v552_v0  ;;  %445 = vmatprep.subr.mxu1 %v552_v0  ;;  %v341_v55 = vld [vmem:[%s767_s4] ss:$0 sm:$0xff]  ;;  %p526_p5 = scmp.ne.s32.totalorder %s332_s27, %s525_s5  ;;  %p531_p7 = scmp.lt.s32.totalorder %s525_s5, %s525_s5 }
  0x21   :  { %411 = vmatpush3.msra.mxu0 %v49_v15  ;;  %446 = vmatpush3.msra.mxu1 %v143_v20  ;;  %v342_v60 = vld [vmem:[%s769_s6] ss:$0 sm:$0xff] }
  0x22   :  { %412 = vmatprep.subr.mxu0 %v552_v0  ;;  %447 = vmatprep.subr.mxu1 %v552_v0  ;;  %p532_p8 = por %p531_p7, %p530_p6 }
  0x23   :  { %413 = vmatpush3.msra.mxu0 %v48_v17  ;;  %448 = vmatpush3.msra.mxu1 %v142_v22 }
  0x24   :  { %414 = vmatprep.subr.mxu0 %v552_v0  ;;  %449 = vmatprep.subr.mxu1 %v552_v0  ;;  %p533_p9 = pnand %p532_p8, %p526_p5 }
  0x25   :  { %415 = vmatpush3.msra.mxu0 %v47_v19  ;;  %450 = vmatpush3.msra.mxu1 %v141_v24 }
  0x26   :  { %416 = vmatprep.subr.mxu0 %v552_v0  ;;  %451 = vmatprep.subr.mxu1 %v552_v0 }
  0x27   :  { %417 = vmatpush3.msra.mxu0 %v46_v21  ;;  %452 = vmatpush3.msra.mxu1 %v140_v26 }
  0x28   :  { %418 = vmatprep.subr.mxu0 %v552_v0  ;;  %453 = vmatprep.subr.mxu1 %v552_v0 }
  0x29   :  { %419 = vmatpush3.msra.mxu0 %v45_v23  ;;  %454 = vmatpush3.msra.mxu1 %v139_v28 }
  0x2a   :  { %420 = vmatprep.subr.mxu0 %v552_v0  ;;  %455 = vmatprep.subr.mxu1 %v552_v0 }
  0x2b   :  { %421 = vmatpush3.msra.mxu0 %v44_v25  ;;  %456 = vmatpush3.msra.mxu1 %v138_v31 }
  0x2c   :  { %422 = vmatprep.subr.mxu0 %v552_v0  ;;  %457 = vmatprep.subr.mxu1 %v552_v0 }
  0x2d   :  { %423 = vmatpush3.msra.mxu0 %v43_v27  ;;  %458 = vmatpush3.msra.mxu1 %v137_v32 }
  0x2e   :  { %424 = vmatprep.subr.mxu0 %v552_v0  ;;  %459 = vmatprep.subr.mxu1 %v552_v0 }
  0x2f   :  { %425 = vmatpush3.msra.mxu0 %v42_v29  ;;  %460 = vmatpush3.msra.mxu1 %v136_v33 }
  0x30   :  { %427 = vmatmul.mubr.f32.vlgmr.msra.gmra.mxu0 %v41_v30  ;;  %464 = vmatprep.subr.mxu0 %v552_v0 }
  0x31   :  { %496 = vmatprep.mubr.msk.f32.mxu0 %vm553_vm0, %v552_v0  ;;  %465 = vmatpush3.msra.mxu0 %v245_v34 }
  0x32   :  { %466 = vmatprep.subr.mxu0 %v552_v0 }
  0x33   :  { %467 = vmatpush3.msra.mxu0 %v244_v35 }
  0x34   :  { %468 = vmatprep.subr.mxu0 %v552_v0 }
  0x35   :  { %469 = vmatpush3.msra.mxu0 %v243_v36 }
  0x36   :  { %470 = vmatprep.subr.mxu0 %v552_v0 }
  0x37   :  { %471 = vmatpush3.msra.mxu0 %v242_v37 }
  0x38   :  { %472 = vmatprep.subr.mxu0 %v552_v0 }
  0x39   :  { %473 = vmatpush3.msra.mxu0 %v241_v38 }
  0x3a   :  { %474 = vmatprep.subr.mxu0 %v552_v0 }
  0x3b   :  { %475 = vmatpush3.msra.mxu0 %v240_v39 }
  0x3c   :  { %476 = vmatprep.subr.mxu0 %v552_v0 }
  0x3d   :  { %477 = vmatpush3.msra.mxu0 %v239_v40 }
  0x3e   :  { %478 = vmatprep.subr.mxu0 %v552_v0 }
  0x3f   :  { %479 = vmatpush3.msra.mxu0 %v238_v41 }
  0x40   :  { %480 = vmatprep.subr.mxu0 %v552_v0 }
  0x41   :  { %481 = vmatpush3.msra.mxu0 %v237_v42 }
  0x42   :  { %482 = vmatprep.subr.mxu0 %v552_v0 }
  0x43   :  { %483 = vmatpush3.msra.mxu0 %v236_v43 }
  0x44   :  { %484 = vmatprep.subr.mxu0 %v552_v0 }
  0x45   :  { %485 = vmatpush3.msra.mxu0 %v235_v44 }
  0x46   :  { %486 = vmatprep.subr.mxu0 %v552_v0 }
  0x47   :  { %487 = vmatpush3.msra.mxu0 %v234_v45 }
  0x48   :  { %488 = vmatprep.subr.mxu0 %v552_v0 }
  0x49   :  { %489 = vmatpush3.msra.mxu0 %v233_v46 }
  0x4a   :  { %490 = vmatprep.subr.mxu0 %v552_v0 }
  0x4b   :  { %491 = vmatpush3.msra.mxu0 %v232_v52 }
  0x4c   :  { %492 = vmatprep.subr.mxu0 %v552_v0 }
  0x4d   :  { %493 = vmatpush3.msra.mxu0 %v231_v53 }
  0x4e   :  { %494 = vmatprep.subr.mxu0 %v552_v0 }
  0x4f   :  { %495 = vmatpush3.msra.mxu0 %v230_v54 }
  0xf0   :  { %v131_v48 = vpop.f32.mrf.mxu0 }
  0xf1   :  { %v132_v49 = vadd.f32 %v340_v47, %v131_v48 }
  0xf2   :  { %v428_v50 = vpop.f32.mrf.mxu0 }
  0xf3   :  { %v135_v51 = vmax.f32 %v132_v49, 0.0 }
  0xf5   :  { %462 = vmatmul.mubr.f32.vlgmr.msra.gmra.mxu1 %v135_v51 }
 0x1b5   :  { %v225_v56 = vpop.f32.mrf.mxu1 }
 0x1b6   :  { %v226_v57 = vadd.f32 %v341_v55, %v225_v56 }
 0x1b7   :  { %v463_v58 = vpop.f32.mrf.mxu1 }
 0x1b8   :  { %v229_v59 = vmax.f32 %v226_v57, 0.0 }
 0x1ba   :  { %497 = vmatmul.mubr.f32.vlgmr.msra.gmra.mxu0 %v229_v59 }
 0x27a   :  { %v319_v61 = vpop.f32.mrf.mxu0 }
 0x27b   :  { %v320_v62 = vadd.f32 %v342_v60, %v319_v61 }
 0x27c   :  { %v498_v63 = vpop.f32.mrf.mxu0 }
 0x27d   :  { %324 = vst.msk [vmem:[#allocation5] sm:$0x3] %vm323_vm1, %v320_v62 }
 0x27e   :  { %536 = shalt.err (!%p533_p9)
}
 0x27f   :  { %334 = dma.vmem_to_hbm [thread:$0]  %s332_s27, 32, %s770_s7, [#allocation4]  }
 0x280   :  { %547 = dma.done.wait [#allocation4], 32  }
 0x281   :  { %548 = vsyncadd [#allocation4], 4294967264 }
 0x282   :  { %338 = vsyncpa [#allocation3], 1 }
 0x283   :  { %339 = vsyncpa [#allocation4], 1 }

</bundles_post_ra>
